<compile_context>
chip_gen: v7x
topology: tpu7x:2x2x1
jax: 0.10.0
libtpu: 0.0.40
codegen_flags: <defaults>
</compile_context>

<pallas_src>
import jax
import jax.numpy as jnp
from jax.experimental import pallas as pl
from jax.experimental.pallas import tpu as pltpu


# ----------------------------------------------------------------------------- kernels
def _fused_bias_kernel(x_ref, w_ref, b_ref, o_ref):
    x = x_ref[...].astype(w_ref.dtype)                     # in-VMEM cast to compute dtype
    acc = jnp.dot(x, w_ref[...], preferred_element_type=jnp.float32)
    o_ref[...] = (acc + b_ref[...]).astype(o_ref.dtype)


def _fused_nobias_kernel(x_ref, w_ref, o_ref):
    x = x_ref[...].astype(w_ref.dtype)
    acc = jnp.dot(x, w_ref[...], preferred_element_type=jnp.float32)
    o_ref[...] = acc.astype(o_ref.dtype)


# ----------------------------------------------------------------------------- param prep
def prepare_cond_layers_params(w_expr, b_expr=None, w_cond=None, *, n_cond=0,
                               compute_dtype=jnp.bfloat16):
    """Hoist to model init: fuse expr/cond weights and pre-cast to the compute dtype.

    w_expr: (n_in, n_out)   = expr_L.weight.T
    b_expr: (1, n_out)/None = expr_L.bias
    w_cond: (n_cond, n_out) = cond_L.weight.T (required iff n_cond > 0)
    """
    if n_cond == 0:
        w_full = jnp.asarray(w_expr)
    else:
        assert w_cond is not None, "w_cond required when n_cond > 0"
        w_full = jnp.concatenate([jnp.asarray(w_expr), jnp.asarray(w_cond)], axis=0)
    w_full = w_full.astype(compute_dtype)
    bias = None if b_expr is None else jnp.asarray(b_expr, jnp.float32).reshape(1, -1)
    return w_full, bias


# ----------------------------------------------------------------------------- forward
def cond_layers_apply(x, w_full, bias=None, *, tile_b=256, tile_n=256):
    """out = x @ w_full (+ bias); x: (B, n_in + n_cond), w_full: (n_in + n_cond, n_out)."""
    B, K = x.shape
    Kw, n_out = w_full.shape
    assert K == Kw, "x feature dim must equal n_in + n_cond"

    # Block sizes: full dim if the array is smaller than the tile (exempt from (8,128)),
    # otherwise the tile (8 / 128 multiples).  Grid uses cdiv; edge blocks are masked on
    # writeback so no B / n_out padding is needed.
    tb = B if B <= tile_b else tile_b
    tn = n_out if n_out <= tile_n else tile_n
    grid = (pl.cdiv(n_out, tn), pl.cdiv(B, tb))            # i (batch) fastest -> W resident

    in_specs = [
        pl.BlockSpec((tb, K), lambda j, i: (i, 0)),        # x panel: changes with i
        pl.BlockSpec((K, tn), lambda j, i: (0, j)),        # W panel: invariant across i
    ]
    args = [x, w_full]
    if bias is not None:
        in_specs.append(pl.BlockSpec((1, tn), lambda j, i: (0, j)))
        args.append(bias)
        kernel = _fused_bias_kernel
    else:
        kernel = _fused_nobias_kernel

    # Double-buffered VMEM estimate (x + W + out + bias) -> explicit scoped-VMEM limit.
    x_bytes = jnp.dtype(x.dtype).itemsize
    w_bytes = jnp.dtype(w_full.dtype).itemsize
    o_bytes = jnp.dtype(x.dtype).itemsize
    est = 2 * (tb * K * x_bytes + K * tn * w_bytes + tb * tn * o_bytes + tn * 4)
    vmem_limit = int(min(max(2 * est, 16 << 20), 48 << 20))
    # TODO(synk): add a k-tiled accumulator path if K ever grows so large that full-K
    # panels exceed the 48 MiB budget (not the case for trVAE layer sizes).

    return pl.pallas_call(
        kernel,
        out_shape=jax.ShapeDtypeStruct((B, n_out), x.dtype),
        grid_spec=pltpu.PrefetchScalarGridSpec(
            num_scalar_prefetch=0,
            grid=grid,
            in_specs=in_specs,
            out_specs=pl.BlockSpec((tb, tn), lambda j, i: (i, j)),
        ),
        compiler_params=pltpu.CompilerParams(
            dimension_semantics=("parallel", "parallel"),
            vmem_limit_bytes=vmem_limit,
        ),
    )(*args)


def cond_layers_forward(x, w_expr, b_expr=None, w_cond=None, *, n_cond=0,
                        compute_dtype=jnp.bfloat16, tile_b=256, tile_n=256):
    """Convenience one-shot wrapper (prep + apply).  In a model, call
    prepare_cond_layers_params once at init and cond_layers_apply per forward."""
    w_full, bias = prepare_cond_layers_params(
        w_expr, b_expr, w_cond, n_cond=n_cond, compute_dtype=compute_dtype)
    return cond_layers_apply(x, w_full, bias, tile_b=tile_b, tile_n=tile_n)


# ----------------------------------------------------------------------------- demo
if __name__ == "__main__":
    key = jax.random.PRNGKey(0)
    k1, k2, k3, k4, k5 = jax.random.split(key, 5)

    # --- Small shapes consistent with the module (single-block grid). ---
    B, N_IN, N_COND, N_OUT = 8, 32, 8, 32
    x = jax.random.normal(k1, (B, N_IN + N_COND), dtype=jnp.float32)
    be = 1.0 / (N_IN ** 0.5)
    bc = 1.0 / (N_COND ** 0.5)
    w_expr = jax.random.uniform(k2, (N_IN, N_OUT), jnp.float32, -be, be)
    b_expr = jax.random.uniform(k3, (1, N_OUT), jnp.float32, -be, be)
    w_cond = jax.random.uniform(k4, (N_COND, N_OUT), jnp.float32, -bc, bc)

    out = jax.block_until_ready(
        cond_layers_forward(x, w_expr, b_expr, w_cond, n_cond=N_COND))
    expr, cond = x[:, :N_IN], x[:, N_IN:]
    ref = expr @ w_expr + b_expr + cond @ w_cond
    assert out.shape == (B, N_OUT)
    assert jnp.allclose(out, ref, atol=2e-2, rtol=1e-2), "cond path mismatch"

    # n_cond == 0 path (expr_L only), and bias=None path.
    out0 = jax.block_until_ready(
        cond_layers_forward(x[:, :N_IN], w_expr, b_expr, n_cond=0))
    assert jnp.allclose(out0, expr @ w_expr + b_expr, atol=2e-2, rtol=1e-2)
    out_nb = jax.block_until_ready(
        cond_layers_forward(x[:, :N_IN], w_expr, None, n_cond=0))
    assert jnp.allclose(out_nb, expr @ w_expr, atol=2e-2, rtol=1e-2)

    # f32 compute-dtype path (same kernel, no cast).
    out_f32 = jax.block_until_ready(
        cond_layers_forward(x, w_expr, b_expr, w_cond, n_cond=N_COND,
                            compute_dtype=jnp.float32))
    assert jnp.allclose(out_f32, ref, atol=2e-2, rtol=1e-2)

    # --- Non-aligned, multi-block shapes: exercises cdiv grid, masked edge blocks,
    #     and the W-resident (j, i) iteration order. ---
    B2, N_IN2, N_COND2, N_OUT2 = 384, 300, 20, 200
    x2 = jax.random.normal(k5, (B2, N_IN2 + N_COND2), dtype=jnp.float32)
    w_expr2 = 0.05 * jax.random.normal(k2, (N_IN2, N_OUT2), dtype=jnp.float32)
    b_expr2 = 0.05 * jax.random.normal(k3, (1, N_OUT2), dtype=jnp.float32)
    w_cond2 = 0.05 * jax.random.normal(k4, (N_COND2, N_OUT2), dtype=jnp.float32)
    out2 = jax.block_until_ready(
        cond_layers_forward(x2, w_expr2, b_expr2, w_cond2, n_cond=N_COND2,
                            tile_b=128, tile_n=128))
    ref2 = x2[:, :N_IN2] @ w_expr2 + b_expr2 + x2[:, N_IN2:] @ w_cond2
    assert out2.shape == (B2, N_OUT2)
    assert jnp.allclose(out2, ref2, atol=6e-2, rtol=2e-2), "tiled path mismatch"

    print("KERNEL_OK")
</pallas_src>

<mosaic_0001>
module attributes {stable_mosaic.version = 11 : i64} {
  func.func @_fused_bias_kernel(%arg0: i32, %arg1: i32, %arg2: memref<8x40xf32, #tpu.memory_space<vmem>>, %arg3: memref<40x32xbf16, #tpu.memory_space<vmem>>, %arg4: memref<1x32xf32, #tpu.memory_space<vmem>>, %arg5: memref<8x32xf32, #tpu.memory_space<vmem>>) attributes {dimension_semantics = [#tpu.dimension_semantics<parallel>, #tpu.dimension_semantics<parallel>], iteration_bounds = array<i64: 1, 1>, scalar_prefetch = 0 : i64, scratch_operands = 0 : i64, tpu.core_type = #tpu.core_type<tc>, window_params = [{transform_indices = @transform_0, window_bounds = array<i64: 8, 40>}, {transform_indices = @transform_1, window_bounds = array<i64: 40, 32>}, {transform_indices = @transform_2, window_bounds = array<i64: 1, 32>}, {transform_indices = @transform_3, window_bounds = array<i64: 8, 32>}]} {
    %c0 = arith.constant 0 : index
    %c0_0 = arith.constant 0 : index
    %0 = vector.load %arg2[%c0, %c0_0] : memref<8x40xf32, #tpu.memory_space<vmem>>, vector<8x40xf32>
    %1 = arith.truncf %0 : vector<8x40xf32> to vector<8x40xbf16>
    %c0_1 = arith.constant 0 : index
    %c0_2 = arith.constant 0 : index
    %2 = vector.load %arg3[%c0_1, %c0_2] : memref<40x32xbf16, #tpu.memory_space<vmem>>, vector<40x32xbf16>
    %cst = arith.constant dense<0.000000e+00> : vector<8x32xf32>
    %3 = tpu.matmul %1, %2, %cst {dimension_numbers = #tpu.dot_dimension_numbers<[1], [0], [0], [1], [0, 0, 1, 1], [], []>} : vector<8x40xbf16>, vector<40x32xbf16>, vector<8x32xf32> -> vector<8x32xf32>
    %c0_3 = arith.constant 0 : index
    %c0_4 = arith.constant 0 : index
    %4 = vector.load %arg4[%c0_3, %c0_4] : memref<1x32xf32, #tpu.memory_space<vmem>>, vector<1x32xf32>
    %5 = vector.broadcast %4 : vector<1x32xf32> to vector<8x32xf32>
    %6 = arith.addf %3, %5 : vector<8x32xf32>
    %c0_5 = arith.constant 0 : index
    %c0_6 = arith.constant 0 : index
    %7 = vector.load %arg5[%c0_5, %c0_6] : memref<8x32xf32, #tpu.memory_space<vmem>>, vector<8x32xf32>
    tpu.vector_store %arg5[%c0_5, %c0_6], %6 {strides = array<i32>} : memref<8x32xf32, #tpu.memory_space<vmem>>, vector<8x32xf32>,
    return
  }
  func.func @transform_0(%arg0: i32, %arg1: i32) -> (i32, i32) {
    %c0_i32 = arith.constant 0 : i32
    %c0_i32_0 = arith.constant 0 : i32
    return %arg1, %c0_i32 : i32, i32
  }
  func.func @transform_1(%arg0: i32, %arg1: i32) -> (i32, i32) {
    %c0_i32 = arith.constant 0 : i32
    %c0_i32_0 = arith.constant 0 : i32
    return %c0_i32, %arg0 : i32, i32
  }
  func.func @transform_2(%arg0: i32, %arg1: i32) -> (i32, i32) {
    %c0_i32 = arith.constant 0 : i32
    %c0_i32_0 = arith.constant 0 : i32
    return %c0_i32, %arg0 : i32, i32
  }
  func.func @transform_3(%arg0: i32, %arg1: i32) -> (i32, i32) {
    %c0_i32 = arith.constant 0 : i32
    return %arg1, %arg0 : i32, i32
  }
}

</mosaic_0001>

<bundles_post_ra>
// kernel: tpu_custom_call.1
= control target key start
LH: loop header
LB: loop body
LE: loop exit
PB: predicated region body
PF: predicated region fallthrough
CT: control target
= control target key end

     0   :  { %v158_v1 = vmov 0.0   ;;  %vm159_vm0 = vmmov 0   ;;  %s208_s0 = inlined_call_operand.vmem [shape: f32[8,40], index: 0, kind: input, shape index: {}]   ;;  %s209_s1 = inlined_call_operand.vmem [shape: bf16[40,32], index: 1, kind: input, shape index: {}]   ;;  %s210_s2 = inlined_call_operand.vmem [shape: f32[1,32], index: 2, kind: input, shape index: {}]   ;;  %s211_s3 = inlined_call_operand.hbm [shape: f32[8,32], index: 3, kind: output, shape index: {}]  }
   0x1   :  { %v131_v0 = vld [vmem:[%s209_s1] sm:$0xff]   ;;  %118 = vmatprep.subr.bf16.mxu0 %v158_v1  ;;  %v132_v2 = vld [vmem:[%s209_s1 + $0x8] sm:$0xff]   ;;  %v133_v3 = vld [vmem:[%s209_s1 + $0x10] ss:$0 sps:$4 sm:$0xff]   ;;  %124 = vmatprep.mubr.msk.bf16.mxu0 %vm159_vm0, %v158_v1 }
   0x2   :  { %119 = vmatpush3.bf16.msra.mxu0 %v131_v0 }
   0x3   :  { %120 = vmatprep.subr.bf16.mxu0 %v158_v1 }
   0x4   :  { %8 = vsyncpa [#allocation3], 0  ;;  %vm49_vm1 = vcmask 1043456   ;;  %v16_v4 = vld [vmem:[%s208_s0] sm:$0xff]  ;;  %vm45_vm2 = vcmask 326656   ;;  %s160_s1 = smov [#allocation2]  }
   0x5   :  { %v51_v5 = vsel %vm49_vm1, %v133_v3, 0  ;;  %v17_v6 = vpack.c.bf16 %v16_v4, %v16_v4  ;;  %v109_v7 = vld [vmem:[%s210_s2] ss:$0 sm:$0xff]  ;;  %s101_s22 = sshll.u32 %s160_s1, 4  ;;  %vm93_vm3 = vcmask 261120   ;;  %s102_s22 = int_to_ptr.vmem [resolvable:$true] %s101_s22 }
   0x6   :  { %121 = vmatpush3.bf16.msra.mxu0 %v132_v2  ;;  %s134_s0 = scalar_lea.vmem %s102_s22, 128  ;;  %p139_p1 = scmp.lt.s32.totalorder %s102_s22, %s102_s22 }
   0x7   :  { %122 = vmatprep.subr.bf16.mxu0 %v158_v1  ;;  %p135_p0 = scmp.ne.s32.totalorder %s102_s22, %s134_s0  ;;  %p140_p2 = scmp.lt.s32.totalorder %s134_s0, %s134_s0 }
   0x9   :  { %p141_p3 = por %p140_p2, %p139_p1 }
   0xa   :  { %123 = vmatpush3.bf16.msra.mxu0 %v51_v5 }
   0xb   :  { %p142_p4 = pnand %p141_p3, %p135_p0 }
   0xd   :  { %125 = vmatmul.mubr.msk.bf16.vlgmr.msra.gmra.mrb[0].mxu0 %vm45_vm2, %v17_v6 }
  0xe0   :  { %v87_v8 = vpop.f32.mrb[0].mxu0 }
  0xe1   :  { %v88_v9 = vadd.f32 %v109_v7, %v87_v8  ;;  %v126_v10 = vpop.f32.mrb[1].mxu0 }
  0xe2   :  { %v90_v11 = vpop.f32.mrb[2].mxu0 }
  0xe3   :  { %v127_v12 = vpop.f32.mrb[3].mxu0  ;;  %94 = vst.msk [vmem:[#allocation2] sm:$0xff] %vm93_vm3, %v88_v9 }
  0xe4   :  { %145 = shalt.err (!%p142_p4)
}
  0xe5   :  { %s146_s2 = scalar_lea.hbm %s211_s3, 128 }
  0xe6   :  { %p147_p5 = scmp.ne.s32.totalorder %s211_s3, %s146_s2  ;;  %p150_p6 = scmp.lt.u32.totalorder %s146_s2, %s211_s3 }
  0xe8   :  { %p152_p7 = pnand %p150_p6, %p147_p5 }
  0xea   :  { %155 = shalt.err (!%p152_p7)
}
  0xeb   :  { %104 = dma.vmem_to_hbm [thread:$0]  %s102_s22, 128, %s211_s3, [#allocation3]  }
  0xec   :  { %156 = dma.done.wait [#allocation3], 128  }
  0xed   :  { %157 = vsyncadd [#allocation3], 4294967168 }
  0xee   :  { %108 = vsyncpa [#allocation3], 1 }

</bundles_post_ra>
